<compile_context>
chip_gen: v7x
topology: tpu7x:2x2x1
jax: 0.10.0
libtpu: 0.0.40
codegen_flags: <defaults>
</compile_context>

<pallas_src>
import numpy as np
import jax
import jax.numpy as jnp
from jax import lax
from jax.experimental import pallas as pl
from jax.experimental.pallas import tpu as pltpu

_LANE = 128


def _round_up(n, m):
    return ((n + m - 1) // m) * m


def _detect_num_tensorcores():
    """Best effort: v7x exposes 2 TensorCores per chip; v5e/v6e have 1."""
    try:
        kind = jax.devices()[0].device_kind.lower()
    except Exception:
        return 1
    return 2 if ("v7" in kind or "7x" in kind) else 1


def _make_cb_focal_kernel(gamma, n_total, tile, steps_per_core, needs_mask):
    gamma = float(gamma)
    use_int_gamma = gamma > 0.0 and float(gamma).is_integer() and gamma <= 8.0
    int_gamma = int(gamma) if use_int_gamma else None

    def kernel(x_ref, y_ref, w_ref, out_ref, acc_num, acc_den):
        step = pl.program_id(1)

        @pl.when(step == 0)
        def _init():
            acc_num[...] = jnp.zeros_like(acc_num)
            acc_den[...] = jnp.zeros_like(acc_den)

        x = x_ref[...].astype(jnp.float32)     # [C, T] logits (classes on sublanes)
        y = y_ref[...]                         # [1, T] int32 labels
        w = w_ref[...].astype(jnp.float32)     # [C, 1] class weights (resident)
        C, T = x.shape

        cls = lax.broadcasted_iota(jnp.int32, (C, T), 0)
        hit = cls == y                                           # one_hot pattern [C, T]
        in_range = jnp.logical_and(y >= 0, y < C)                # [1, T]

        if needs_mask:
            # Partial / duplicated (clamped) tiles: mask by global column index.
            core = pl.program_id(0)
            tile_idx = core * steps_per_core + step
            col = lax.broadcasted_iota(jnp.int32, (1, T), 1)
            valid = (col + tile_idx * tile) < n_total            # [1, T]
            x = jnp.where(valid, x, 0.0)                         # keep OOB garbage finite
            hit = jnp.logical_and(hit, valid)
            in_range = jnp.logical_and(in_range, valid)

        labels = hit.astype(jnp.float32)                         # one_hot(y, C) [C, T]
        cnt = in_range.astype(jnp.float32)                       # sum_c one_hot  [1, T]

        # per-example weight alpha = class_weights[y] (gather-free sublane reduce)
        alpha = jnp.sum(labels * w, axis=0, keepdims=True)       # [1, T]

        relu_x = jnp.maximum(x, 0.0)
        t = jnp.exp(-jnp.abs(x))                                 # shared exp(-|x|)  (EUP)
        sp = jnp.log1p(t)                                        # softplus(-|x|)    (EUP)
        yx = x * labels

        # stable binary_cross_entropy_with_logits, reduction='none'
        bce = relu_x - yx + sp                                   # [C, T]

        if gamma == 0.0:
            mod_bce = bce
        elif int_gamma is not None:
            # modulator = exp(-g*(y*x + log(1+exp(-x)))) == sigmoid((1-2y)*x) ** g.
            # Reuse t = exp(-|x|); only an approx reciprocal is needed (no extra exp).
            z = (1.0 - 2.0 * labels) * x
            r = pl.reciprocal(1.0 + t, approx=True)
            s = jnp.where(z >= 0.0, r, t * r)                    # sigmoid(z), stable
            mod = s
            for _ in range(int_gamma - 1):
                mod = mod * s
            mod_bce = mod * bce
        else:
            # non-integer gamma: exact exp(-gamma * softplus) form
            mod_bce = jnp.exp(-gamma * (yx + (relu_x - x) + sp)) * bce

        per_ex = jnp.sum(mod_bce, axis=0, keepdims=True)         # [1, T]

        # lane-wise accumulation; cross-lane reduce only once, at finalize
        acc_num[...] = acc_num[...] + alpha * per_ex
        acc_den[...] = acc_den[...] + cnt

        @pl.when(step == pl.num_programs(1) - 1)
        def _finalize():
            out_ref[0, 0] = jnp.sum(acc_num[...])
            out_ref[0, 1] = jnp.sum(acc_den[...])

    return kernel


def _cb_focal_loss_pallas(x_cn, y, class_weights, gamma, *, tile_n=32768, num_cores=None):
    """x_cn: [C, N] logits (batch on lanes), y: [N] int labels, class_weights: [C]."""
    C, N = x_cn.shape
    if N == 0:
        return jnp.float32(float("nan"))

    if num_cores is None:
        num_cores = _detect_num_tensorcores()

    # Lane-aligned tile (multiple of 128; relies on C == full class dim for the
    # sublane rule), clamped to the lane-rounded batch size.
    tile = max(_LANE, (int(tile_n) // _LANE) * _LANE)
    tile = min(tile, _round_up(N, _LANE))
    tiles_total = pl.cdiv(N, tile)
    num_cores = max(1, min(int(num_cores), tiles_total))
    steps_per_core = pl.cdiv(tiles_total, num_cores)
    needs_mask = (num_cores * steps_per_core * tile) != N

    yt = y.reshape(1, N).astype(jnp.int32)
    wt = class_weights.reshape(C, 1).astype(jnp.float32)

    def _tile_index(c, i):
        # clamp fully-OOB tiles back in bounds; their contribution is masked to 0
        return jnp.minimum(c * steps_per_core + i, tiles_total - 1)

    # scoped-VMEM budget: double-buffered input blocks + accumulators + f32 temps
    in_itemsize = jnp.dtype(x_cn.dtype).itemsize
    est = 2 * (2 * C * tile * in_itemsize + 2 * tile * 4 + 2 * tile * 4 + 12 * C * tile * 4)
    vmem_limit = int(min(max(est, 32 * 1024 * 1024), 60 * 1024 * 1024))

    partials = pl.pallas_call(
        _make_cb_focal_kernel(gamma, N, tile, steps_per_core, needs_mask),
        out_shape=jax.ShapeDtypeStruct((num_cores, 2), jnp.float32),
        grid_spec=pltpu.PrefetchScalarGridSpec(
            num_scalar_prefetch=0,
            grid=(num_cores, steps_per_core),
            in_specs=[
                pl.BlockSpec((C, tile), lambda c, i: (0, _tile_index(c, i))),  # logits
                pl.BlockSpec((1, tile), lambda c, i: (0, _tile_index(c, i))),  # labels
                pl.BlockSpec((C, 1), lambda c, i: (0, 0)),                      # weights
            ],
            out_specs=pl.BlockSpec((1, 2), lambda c, i: (c, 0),
                                   memory_space=pltpu.MemorySpace.SMEM),
            scratch_shapes=[pltpu.VMEM((1, tile), jnp.float32),   # loss accumulator
                            pltpu.VMEM((1, tile), jnp.float32)],  # label-count accumulator
        ),
        compiler_params=pltpu.CompilerParams(
            dimension_semantics=("parallel", "arbitrary"),
            vmem_limit_bytes=vmem_limit,
        ),
    )(x_cn, yt, wt)

    num = jnp.sum(partials[:, 0])
    den = jnp.sum(partials[:, 1])
    return num / den


def _reference_jax(x, y, class_weights, gamma):
    """Pure-JAX reference mirroring the PyTorch focal path (stable form)."""
    x = x.astype(jnp.float32)
    N, C = x.shape
    labels = jax.nn.one_hot(y, C, dtype=jnp.float32)
    alpha = class_weights[y][:, None]
    relu_x = jnp.maximum(x, 0.0)
    sp = jnp.log1p(jnp.exp(-jnp.abs(x)))
    bce = relu_x - x * labels + sp
    if gamma == 0.0:
        mod = 1.0
    else:
        mod = jnp.exp(-gamma * (labels * x + (relu_x - x) + sp))
    return jnp.sum(alpha * mod * bce) / jnp.sum(labels)


class ClassBalancedLossPallas:
    """JAX/Pallas port of ClassBalancedLoss (loss_type='focal', is_smoothing=False)."""

    def __init__(self, samples_per_class=None, num_classes=7, beta=0.9999, gamma=2.0,
                 weights_factors=None):
        if samples_per_class is None:
            samples_per_class = [1] * num_classes
        self.beta = float(beta)
        effective_num = 1.0 - np.power(beta, samples_per_class)
        weights = (1.0 - beta) / (np.array(effective_num) + 1e-8)
        constant_sum = len(samples_per_class)
        weights = (weights / np.sum(weights) * constant_sum).astype(np.float32)
        if weights_factors is not None:
            weights = weights * np.asarray(weights_factors, dtype=np.float32)
        self.class_weights = jnp.asarray(weights, dtype=jnp.float32)   # [C] f32
        self.gamma = float(gamma)
        self.num_classes = int(num_classes)

    def update(self, samples_per_class):
        if samples_per_class is None:
            return
        effective_num = 1.0 - np.power(self.beta, samples_per_class)
        weights = (1.0 - self.beta) / np.array(effective_num)
        weights = (weights / np.sum(weights) * len(samples_per_class)).astype(np.float32)
        self.class_weights = jnp.asarray(weights, dtype=jnp.float32)

    def __call__(self, x, y, is_mix_up=False, use_pallas=True, logits_are_cn=False,
                 tile_n=32768, num_cores=None):
        del is_mix_up  # unused in the PyTorch forward as well
        y = y.astype(jnp.int32)
        # bf16 logits stream straight into the kernel (halved HBM traffic); other
        # dtypes are promoted to f32 at the boundary.
        if x.dtype not in (jnp.float32, jnp.bfloat16):
            x = x.astype(jnp.float32)
        if not use_pallas:
            x_nc = x.T if logits_are_cn else x
            return _reference_jax(x_nc, y, self.class_weights, self.gamma)
        # NOTE: a standalone [N,C] -> [C,N] relayout costs one extra HBM pass over the
        # dominant array; producers that can emit [C, N] logits should pass
        # logits_are_cn=True to consume HBM directly.
        x_cn = x if logits_are_cn else x.T
        return _cb_focal_loss_pallas(x_cn, y, self.class_weights, self.gamma,
                                     tile_n=tile_n, num_cores=num_cores)


if __name__ == "__main__":
    num_classes = 7
    samples_per_class = [10, 20, 30, 40, 50, 60, 70]
    module = ClassBalancedLossPallas(
        samples_per_class=samples_per_class,
        num_classes=num_classes,
        beta=0.9999,
        gamma=2.0,
    )

    key = jax.random.PRNGKey(0)
    k1, k2, k3, k4 = jax.random.split(key, 4)

    # Small demo shape (single tile, single core).
    x_small = jax.random.normal(k1, (8, num_classes), dtype=jnp.float32)
    y_small = jax.random.randint(k2, (8,), 0, num_classes, dtype=jnp.int32)
    loss_small = module(x_small, y_small)
    jax.block_until_ready(loss_small)
    ref_small = _reference_jax(x_small, y_small, module.class_weights, module.gamma)
    np.testing.assert_allclose(np.asarray(loss_small), np.asarray(ref_small),
                               rtol=2e-2, atol=1e-4)

    # Exercise multi-tile accumulation, partial-tile masking and the 2-core grid path.
    x_big = 3.0 * jax.random.normal(k3, (333, num_classes), dtype=jnp.float32)
    y_big = jax.random.randint(k4, (333,), 0, num_classes, dtype=jnp.int32)
    loss_big = module(x_big, y_big, tile_n=128, num_cores=2)
    jax.block_until_ready(loss_big)
    ref_big = _reference_jax(x_big, y_big, module.class_weights, module.gamma)
    np.testing.assert_allclose(np.asarray(loss_big), np.asarray(ref_big),
                               rtol=2e-2, atol=1e-4)

    print("KERNEL_OK")
</pallas_src>

<mosaic_0001>
module attributes {stable_mosaic.version = 11 : i64} {
  func.func @kernel(%arg0: i32, %arg1: i32, %arg2: memref<7x128xf32, #tpu.memory_space<vmem>>, %arg3: memref<1x128xi32, #tpu.memory_space<vmem>>, %arg4: memref<7x1xf32, #tpu.memory_space<vmem>>, %arg5: memref<1x2xf32, #tpu.memory_space<smem>>, %arg6: memref<1x128xf32, #tpu.memory_space<vmem>>, %arg7: memref<1x128xf32, #tpu.memory_space<vmem>>) attributes {dimension_semantics = [#tpu.dimension_semantics<parallel>, #tpu.dimension_semantics<arbitrary>], iteration_bounds = array<i64: 1, 1>, scalar_prefetch = 0 : i64, scratch_operands = 2 : i64, tpu.core_type = #tpu.core_type<tc>, window_params = [{transform_indices = @transform_0, window_bounds = array<i64: 7, 128>}, {transform_indices = @transform_1, window_bounds = array<i64: 1, 128>}, {pipeline_mode = #tpu.pipeline_mode<synchronous>, transform_indices = @transform_2, window_bounds = array<i64: 7, 1>}, {transform_indices = @transform_3, window_bounds = array<i64: 1, 2>}]} {
    %c0_i32 = arith.constant 0 : i32
    %0 = arith.cmpi eq, %arg1, %c0_i32 : i32
    %1 = arith.extui %0 : i1 to i32
    %c0_i32_0 = arith.constant 0 : i32
    %2 = arith.cmpi ne, %1, %c0_i32_0 : i32
    scf.if %2 {
      %cst_25 = arith.constant 0.000000e+00 : f32
      %73 = vector.broadcast %cst_25 : f32 to vector<1x128xf32>
      %c0_26 = arith.constant 0 : index
      %c0_27 = arith.constant 0 : index
      %74 = vector.load %arg6[%c0_26, %c0_27] : memref<1x128xf32, #tpu.memory_space<vmem>>, vector<1x128xf32>
      tpu.vector_store %arg6[%c0_26, %c0_27], %73 {strides = array<i32>} : memref<1x128xf32, #tpu.memory_space<vmem>>, vector<1x128xf32>,
      %cst_28 = arith.constant 0.000000e+00 : f32
      %75 = vector.broadcast %cst_28 : f32 to vector<1x128xf32>
      %c0_29 = arith.constant 0 : index
      %c0_30 = arith.constant 0 : index
      %76 = vector.load %arg7[%c0_29, %c0_30] : memref<1x128xf32, #tpu.memory_space<vmem>>, vector<1x128xf32>
      tpu.vector_store %arg7[%c0_29, %c0_30], %75 {strides = array<i32>} : memref<1x128xf32, #tpu.memory_space<vmem>>, vector<1x128xf32>,
    } else {
    }
    %c0 = arith.constant 0 : index
    %c0_1 = arith.constant 0 : index
    %3 = vector.load %arg2[%c0, %c0_1] : memref<7x128xf32, #tpu.memory_space<vmem>>, vector<7x128xf32>
    %c0_2 = arith.constant 0 : index
    %c0_3 = arith.constant 0 : index
    %4 = vector.load %arg3[%c0_2, %c0_3] : memref<1x128xi32, #tpu.memory_space<vmem>>, vector<1x128xi32>
    %c0_4 = arith.constant 0 : index
    %c0_5 = arith.constant 0 : index
    %5 = vector.load %arg4[%c0_4, %c0_5] : memref<7x1xf32, #tpu.memory_space<vmem>>, vector<7x1xf32>
    %6 = tpu.iota {dimensions = array<i32: 0>} : vector<7x128xi32>
    %7 = vector.broadcast %4 : vector<1x128xi32> to vector<7x128xi32>
    %8 = arith.cmpi eq, %6, %7 : vector<7x128xi32>
    %c0_i32_6 = arith.constant 0 : i32
    %9 = vector.broadcast %c0_i32_6 : i32 to vector<1x128xi32>
    %10 = arith.cmpi sge, %4, %9 : vector<1x128xi32>
    %c7_i32 = arith.constant 7 : i32
    %11 = vector.broadcast %c7_i32 : i32 to vector<1x128xi32>
    %12 = arith.cmpi slt, %4, %11 : vector<1x128xi32>
    %13 = arith.andi %10, %12 : vector<1x128xi1>
    %c1_i32 = arith.constant 1 : i32
    %14 = arith.muli %arg0, %c1_i32 : i32
    %15 = arith.addi %14, %arg1 : i32
    %16 = tpu.iota {dimensions = array<i32: 1>} : vector<1x128xi32>
    %c128_i32 = arith.constant 128 : i32
    %17 = arith.muli %15, %c128_i32 : i32
    %18 = vector.broadcast %17 : i32 to vector<1x128xi32>
    %19 = arith.addi %16, %18 : vector<1x128xi32>
    %c8_i32 = arith.constant 8 : i32
    %20 = vector.broadcast %c8_i32 : i32 to vector<1x128xi32>
    %21 = arith.cmpi slt, %19, %20 : vector<1x128xi32>
    %cst = arith.constant 0.000000e+00 : f32
    %22 = vector.shape_cast %21 : vector<1x128xi1> to vector<1x128xi1>
    %23 = vector.broadcast %22 : vector<1x128xi1> to vector<7x128xi1>
    %24 = vector.broadcast %cst : f32 to vector<7x128xf32>
    %25 = arith.select %23, %3, %24 : vector<7x128xi1>, vector<7x128xf32>
    %26 = vector.broadcast %21 : vector<1x128xi1> to vector<7x128xi1>
    %27 = arith.andi %8, %26 : vector<7x128xi1>
    %28 = arith.andi %13, %21 : vector<1x128xi1>
    %29 = arith.extui %27 : vector<7x128xi1> to vector<7x128xi32>
    %30 = arith.sitofp %29 : vector<7x128xi32> to vector<7x128xf32>
    %31 = arith.extui %28 : vector<1x128xi1> to vector<1x128xi32>
    %32 = arith.sitofp %31 : vector<1x128xi32> to vector<1x128xf32>
    %33 = vector.broadcast %5 : vector<7x1xf32> to vector<7x128xf32>
    %34 = arith.mulf %30, %33 : vector<7x128xf32>
    %cst_7 = arith.constant dense<0.000000e+00> : vector<128xf32>
    %35 = vector.multi_reduction <add>, %34, %cst_7 [0] : vector<7x128xf32> to vector<128xf32>
    %36 = vector.shape_cast %35 : vector<128xf32> to vector<1x128xf32>
    %cst_8 = arith.constant 0.000000e+00 : f32
    %37 = vector.broadcast %cst_8 : f32 to vector<7x128xf32>
    %38 = arith.maximumf %25, %37 : vector<7x128xf32>
    %39 = math.absf %25 : vector<7x128xf32>
    %cst_9 = arith.constant 0.000000e+00 : f32
    %40 = vector.broadcast %cst_9 : f32 to vector<7x128xf32>
    %41 = arith.subf %40, %39 : vector<7x128xf32>
    %42 = math.exp %41 : vector<7x128xf32>
    %43 = math.log1p %42 : vector<7x128xf32>
    %44 = arith.mulf %25, %30 : vector<7x128xf32>
    %45 = arith.subf %38, %44 : vector<7x128xf32>
    %46 = arith.addf %45, %43 : vector<7x128xf32>
    %cst_10 = arith.constant 2.000000e+00 : f32
    %47 = vector.broadcast %cst_10 : f32 to vector<7x128xf32>
    %48 = arith.mulf %47, %30 : vector<7x128xf32>
    %cst_11 = arith.constant 1.000000e+00 : f32
    %49 = vector.broadcast %cst_11 : f32 to vector<7x128xf32>
    %50 = arith.subf %49, %48 : vector<7x128xf32>
    %51 = arith.mulf %50, %25 : vector<7x128xf32>
    %cst_12 = arith.constant 1.000000e+00 : f32
    %52 = vector.broadcast %cst_12 : f32 to vector<7x128xf32>
    %53 = arith.addf %52, %42 : vector<7x128xf32>
    %54 = tpu.reciprocal %53 {approx = true} : vector<7x128xf32> -> vector<7x128xf32>
    %cst_13 = arith.constant 0.000000e+00 : f32
    %55 = vector.broadcast %cst_13 : f32 to vector<7x128xf32>
    %56 = arith.cmpf oge, %51, %55 : vector<7x128xf32>
    %57 = arith.mulf %42, %54 : vector<7x128xf32>
    %58 = arith.select %56, %54, %57 : vector<7x128xi1>, vector<7x128xf32>
    %59 = arith.mulf %58, %58 : vector<7x128xf32>
    %60 = arith.mulf %59, %46 : vector<7x128xf32>
    %cst_14 = arith.constant dense<0.000000e+00> : vector<128xf32>
    %61 = vector.multi_reduction <add>, %60, %cst_14 [0] : vector<7x128xf32> to vector<128xf32>
    %62 = vector.shape_cast %61 : vector<128xf32> to vector<1x128xf32>
    %c0_15 = arith.constant 0 : index
    %c0_16 = arith.constant 0 : index
    %63 = vector.load %arg6[%c0_15, %c0_16] : memref<1x128xf32, #tpu.memory_space<vmem>>, vector<1x128xf32>
    %64 = arith.mulf %36, %62 : vector<1x128xf32>
    %65 = arith.addf %63, %64 : vector<1x128xf32>
    %c0_17 = arith.constant 0 : index
    %c0_18 = arith.constant 0 : index
    %66 = vector.load %arg6[%c0_17, %c0_18] : memref<1x128xf32, #tpu.memory_space<vmem>>, vector<1x128xf32>
    tpu.vector_store %arg6[%c0_17, %c0_18], %65 {strides = array<i32>} : memref<1x128xf32, #tpu.memory_space<vmem>>, vector<1x128xf32>,
    %c0_19 = arith.constant 0 : index
    %c0_20 = arith.constant 0 : index
    %67 = vector.load %arg7[%c0_19, %c0_20] : memref<1x128xf32, #tpu.memory_space<vmem>>, vector<1x128xf32>
    %68 = arith.addf %67, %32 : vector<1x128xf32>
    %c0_21 = arith.constant 0 : index
    %c0_22 = arith.constant 0 : index
    %69 = vector.load %arg7[%c0_21, %c0_22] : memref<1x128xf32, #tpu.memory_space<vmem>>, vector<1x128xf32>
    tpu.vector_store %arg7[%c0_21, %c0_22], %68 {strides = array<i32>} : memref<1x128xf32, #tpu.memory_space<vmem>>, vector<1x128xf32>,
    %c0_i32_23 = arith.constant 0 : i32
    %70 = arith.cmpi eq, %arg1, %c0_i32_23 : i32
    %71 = arith.extui %70 : i1 to i32
    %c0_i32_24 = arith.constant 0 : i32
    %72 = arith.cmpi ne, %71, %c0_i32_24 : i32
    scf.if %72 {
      %c0_25 = arith.constant 0 : index
      %c0_26 = arith.constant 0 : index
      %73 = vector.load %arg6[%c0_25, %c0_26] : memref<1x128xf32, #tpu.memory_space<vmem>>, vector<1x128xf32>
      %74 = vector.shape_cast %73 : vector<1x128xf32> to vector<1x1x128xf32>
      %cst_27 = arith.constant dense<0.000000e+00> : vector<1xf32>
      %75 = vector.multi_reduction <add>, %74, %cst_27 [1, 2] : vector<1x1x128xf32> to vector<1xf32>
      %76 = vector.shape_cast %75 : vector<1xf32> to vector<1x1x1xf32>
      %77 = vector.extract %76[0, 0, 0] : f32 from vector<1x1x1xf32>
      %c0_28 = arith.constant 0 : index
      %c0_29 = arith.constant 0 : index
      %78 = memref.load %arg5[%c0_28, %c0_29] : memref<1x2xf32, #tpu.memory_space<smem>>
      memref.store %77, %arg5[%c0_28, %c0_29] : memref<1x2xf32, #tpu.memory_space<smem>>
      %c0_30 = arith.constant 0 : index
      %c0_31 = arith.constant 0 : index
      %79 = vector.load %arg7[%c0_30, %c0_31] : memref<1x128xf32, #tpu.memory_space<vmem>>, vector<1x128xf32>
      %80 = vector.shape_cast %79 : vector<1x128xf32> to vector<1x1x128xf32>
      %cst_32 = arith.constant dense<0.000000e+00> : vector<1xf32>
      %81 = vector.multi_reduction <add>, %80, %cst_32 [1, 2] : vector<1x1x128xf32> to vector<1xf32>
      %82 = vector.shape_cast %81 : vector<1xf32> to vector<1x1x1xf32>
      %83 = vector.extract %82[0, 0, 0] : f32 from vector<1x1x1xf32>
      %c0_33 = arith.constant 0 : index
      %c1 = arith.constant 1 : index
      %84 = memref.load %arg5[%c0_33, %c1] : memref<1x2xf32, #tpu.memory_space<smem>>
      memref.store %83, %arg5[%c0_33, %c1] : memref<1x2xf32, #tpu.memory_space<smem>>
    } else {
    }
    return
  }
  func.func @transform_0(%arg0: i32, %arg1: i32) -> (i32, i32) {
    %c1_i32 = arith.constant 1 : i32
    %0 = arith.muli %arg0, %c1_i32 : i32
    %1 = arith.addi %0, %arg1 : i32
    %c0_i32 = arith.constant 0 : i32
    %2 = arith.minsi %1, %c0_i32 : i32
    %c0_i32_0 = arith.constant 0 : i32
    %c0_i32_1 = arith.constant 0 : i32
    return %c0_i32_0, %2 : i32, i32
  }
  func.func @transform_1(%arg0: i32, %arg1: i32) -> (i32, i32) {
    %c1_i32 = arith.constant 1 : i32
    %0 = arith.muli %arg0, %c1_i32 : i32
    %1 = arith.addi %0, %arg1 : i32
    %c0_i32 = arith.constant 0 : i32
    %2 = arith.minsi %1, %c0_i32 : i32
    %c0_i32_0 = arith.constant 0 : i32
    %c0_i32_1 = arith.constant 0 : i32
    return %c0_i32_0, %2 : i32, i32
  }
  func.func @transform_2(%arg0: i32, %arg1: i32) -> (i32, i32) {
    %c0_i32 = arith.constant 0 : i32
    %c0_i32_0 = arith.constant 0 : i32
    %c0_i32_1 = arith.constant 0 : i32
    return %c0_i32, %c0_i32_0 : i32, i32
  }
  func.func @transform_3(%arg0: i32, %arg1: i32) -> (i32, i32) {
    %c0_i32 = arith.constant 0 : i32
    %c0_i32_0 = arith.constant 0 : i32
    return %arg0, %c0_i32 : i32, i32
  }
}

</mosaic_0001>

<bundles_post_ra>
// kernel: tpu_custom_call.1
= control target key start
LH: loop header
LB: loop body
LE: loop exit
PB: predicated region body
PF: predicated region fallthrough
CT: control target
= control target key end

     0   :  { %v75_v1 = vlaneseq  ;;  %v236_v2 = vmov 0   ;;  %v237_v3 = vmov 0.0   ;;  %s282_s0 = inlined_call_operand.vmem [shape: f32[7,8], index: 0, kind: input, shape index: {}]   ;;  %s283_s1 = inlined_call_operand.vmem [shape: s32[1,8], index: 1, kind: input, shape index: {}]   ;;  %s284_s2 = inlined_call_operand.vmem [shape: f32[7,1], index: 2, kind: input, shape index: {}]   ;;  %s285_s3 = inlined_call_operand.hbm [shape: f32[1,2], index: 3, kind: output, shape index: {}]  }
   0x1   :  { %v74_v0 = vld [vmem:[%s284_s2] sm:$0x7f]  ;;  %217 = vset.pattern.permute.xlu0 %v236_v2  ;;  %70 = vst [vmem:[#allocation2] sm:$0x1] %v237_v3  ;;  %71 = vst [vmem:[#allocation3] sm:$0x1] %v237_v3 }
   0x2   :  { %v73_v4 = vld [vmem:[%s283_s1] sm:$0x1] }
   0x3   :  { %8 = vsyncpa [#allocation5], 0  ;;  %103 = vperm.xlu0 %217, %v74_v0   ;;  %v76_v5 = vshrl.u32 %v75_v1, 7  ;;  %v87_v6 = vand.u32 127, %v75_v1  ;;  %v72_v7 = vld [vmem:[%s282_s0] sm:$0x7f] }
   0x4   :  { %vm82_vm0 = vcmp.ge.s32.totalorder %v73_v4, 0  ;;  %vm83_vm1 = vcmp.lt.s32.totalorder %v73_v4, 7  ;;  %vm160_vm7 = vcmask 1040384   ;;  %vm107_vm10 = vcmask 1046528   ;;  %s224_s19 = scalar_lea.hbm %s285_s3, 16 }
   0x5   :  { %v79_v8 = vsub.s32 0, %v76_v5  ;;  %vm91_vm2 = vcmp.lt.s32.totalorder %v87_v6, 8  ;;  %vm84_vm3 = vmand %vm82_vm0, %vm83_vm1  ;;  %p225_p0 = scmp.ne.s32.totalorder %s285_s3, %s224_s19  ;;  %p228_p1 = scmp.lt.u32.totalorder %s224_s19, %s285_s3 }
   0x6   :  { %v94_v9 = vsel %vm91_vm2, %v72_v7, 0.0  ;;  %vm96_vm4 = vmand %vm84_vm3, %vm91_vm2 }
   0x7   :  { %v80_v10 = vrot.slane %v73_v4, %v79_v8  ;;  %v116_v11 = vand.u32 2147483647, %v94_v9  ;;  %v115_v13 = vmax.f32 %v94_v9, 0.0  ;;  %v209_v15 = vsel %vm96_vm4, 1.0, %v237_v3  ;;  %p230_p2 = pnand %p228_p1, %p225_p0 }
   0x8   :  { %v153_v19 = vld [vmem:[#allocation3] sm:$0x1]  ;;  %v149_v57 = vld [vmem:[#allocation2] sm:$0x1] }
   0x9   :  { %vm81_vm5 = vcmp.eq.s32.totalorder %v76_v5, %v80_v10  ;;  %v117_v12 = vsub.f32 0.0, %v116_v11  ;;  %v154_v22 = vadd.f32 %v209_v15, %v153_v19 }
   0xa   :  { %vm95_vm6 = vmand %vm81_vm5, %vm91_vm2 }
   0xb   :  { %v208_v14 = vsel %vm95_vm6, 1.0, %v237_v3  ;;  %v118_v16 = vmul.f32 1.442695, %v117_v12  ;;  %155 = vst [vmem:[#allocation3] sm:$0x1] %v154_v22 }
   0xc   :  { %v129_v17 = vmul.f32 %v208_v14, %v94_v9  ;;  %v132_v18 = vmul.f32 2.0, %v208_v14 }
   0xd   :  { %218 = vpow2.f32 %v118_v16 }
   0xe   :  { %v130_v20 = vsub.f32 %v115_v13, %v129_v17  ;;  %v133_v21 = vsub.f32 1.0, %v132_v18 }
  0x10   :  { %v134_v23 = vmul.f32 %v133_v21, %v94_v9 }
  0x12   :  { %v173_v25 = vld [vmem:[#allocation3] sm:$0x1]  ;;  %vm137_vm9 = vcmp.ge.f32.partialorder %v134_v23, 0.0 }
  0x13   :  { %v174_v27 = vsel %vm160_vm7, %v173_v25, 0.0 }
  0x14   :  { %175 = vadd.xlane.f32.xlu1 %v174_v27 }
  0x17   :  { %v219_v24 = vpop.eup %218 }
  0x18   :  { %v120_v26 = vadd.f32 1.0, %v219_v24  ;;  %v123_v28 = vmul.f32 -0.5, %v219_v24  ;;  %v126_v30 = vand.u32 2147483647, %v219_v24 }
  0x1a   :  { %220 = vlog2.f32 %v120_v26  ;;  %v124_v29 = vadd.f32 1.0, %v123_v28  ;;  %vm127_vm8 = vcmp.lt.f32.partialorder %v126_v30, 0.0004427343 }
  0x1b   :  { %222 = vrcp.f32 %v120_v26 }
  0x1c   :  { %v125_v31 = vmul.f32 %v219_v24, %v124_v29 }
  0x24   :  { %v221_v32 = vpop.eup %220 }
  0x25   :  { %v223_v33 = vpop.eup %222  ;;  %v122_v34 = vmul.f32 0.6931472, %v221_v32 }
  0x26   :  { %v138_v35 = vmul.f32 %v223_v33, %v219_v24 }
  0x27   :  { %v128_v36 = vsel %vm127_vm8, %v125_v31, %v122_v34 }
  0x28   :  { %v131_v37 = vadd.f32 %v130_v20, %v128_v36  ;;  %v139_v38 = vsel %vm137_vm9, %v223_v33, %v138_v35 }
  0x29   :  { %v140_v39 = vmul.f32 %v139_v38, %v139_v38 }
  0x2b   :  { %v141_v40 = vmul.f32 %v140_v39, %v131_v37 }
  0x2d   :  { %v142_v41 = vsel %vm107_vm10, %v141_v40, 0.0 }
  0x2e   :  { %v143_v42 = vrot.slane %v142_v41, 4 }
  0x30   :  { %v144_v43 = vadd.f32 %v143_v42, %v142_v41 }
  0x32   :  { %v145_v45 = vrot.slane %v144_v43, 2 }
  0x34   :  { %v146_v49 = vadd.f32 %v145_v45, %v144_v43 }
  0x36   :  { %v147_v52 = vrot.slane %v146_v49, 1 }
  0x38   :  { %v148_v55 = vadd.f32 %v147_v52, %v146_v49 }
  0x82   :  { %v104_v44 = vpop.permute.xlu0 %103 }
  0x83   :  { %v106_v46 = vmul.f32 %v208_v14, %v104_v44 }
  0x85   :  { %v108_v47 = vsel %vm107_vm10, %v106_v46, 0.0 }
  0x86   :  { %v109_v48 = vrot.slane %v108_v47, 4 }
  0x88   :  { %v110_v50 = vadd.f32 %v109_v48, %v108_v47 }
  0x8a   :  { %v111_v51 = vrot.slane %v110_v50, 2 }
  0x8c   :  { %v112_v53 = vadd.f32 %v111_v51, %v110_v50 }
  0x8e   :  { %v113_v54 = vrot.slane %v112_v53, 1 }
  0x90   :  { %v114_v56 = vadd.f32 %v113_v54, %v112_v53 }
  0x92   :  { %v150_v58 = vmul.f32 %v148_v55, %v114_v56 }
  0x94   :  { %v151_v59 = vadd.f32 %v150_v58, %v149_v57 }
  0x96   :  { %152 = vst [vmem:[#allocation2] sm:$0x1] %v151_v59 }
  0x9d   :  { %v159_v60 = vld [vmem:[#allocation2] sm:$0x1] }
  0x9e   :  { %v161_v61 = vsel %vm160_vm7, %v159_v60, 0.0 }
  0x9f   :  { %162 = vadd.xlane.f32.xlu0 %v161_v61 }
  0xa1   :  { %v176_v62 = vpop.xlane.xlu1 %175 }
  0xa2   :  { %v177_v63 = vrot.slane %v176_v62, 4 }
  0xa4   :  { %v178_v0 = vadd.f32 %v177_v63, %v176_v62 }
  0xa6   :  { %v179_v1 = vrot.slane %v178_v0, 2 }
  0xa8   :  { %v180_v5 = vadd.f32 %v179_v1, %v178_v0 }
  0xaa   :  { %v181_v8 = vrot.slane %v180_v5, 1 }
  0xac   :  { %v182_v11 = vadd.f32 %v181_v8, %v180_v5 }
 0x12c   :  { %v163_v2 = vpop.xlane.xlu0 %162 }
 0x12d   :  { %v164_v3 = vrot.slane %v163_v2, 4 }
 0x12f   :  { %v165_v4 = vadd.f32 %v164_v3, %v163_v2 }
 0x131   :  { %v166_v6 = vrot.slane %v165_v4, 2 }
 0x133   :  { %v167_v7 = vadd.f32 %v166_v6, %v165_v4 }
 0x135   :  { %v168_v9 = vrot.slane %v167_v7, 1 }
 0x137   :  { %v169_v10 = vadd.f32 %v168_v9, %v167_v7 }
 0x139   :  { %210 = vpush %v169_v10 }
 0x13a   :  { %212 = vpush %v182_v11 }
 0x16a   :  { %s211_s0 = spop %210 }
 0x16b   :  { %172 = sst [smem:[#allocation4]] %s211_s0  ;;  %s213_s1 = spop %212 }
 0x16c   :  { %185 = sst [smem:[#allocation4 + $0x1]] %s213_s1 }
 0x16d   :  { %233 = shalt.err (!%p230_p2)
}
 0x16e   :  { %s238_s24 = smov [#allocation4]  }
 0x16f   :  { %193 = dma.smem_to_hbm %s238_s24, 16, %s285_s3, [#allocation5]  }
 0x170   :  { %234 = dma.done.wait [#allocation5], 16  }
 0x171   :  { %235 = vsyncadd [#allocation5], 4294967280 }
 0x172   :  { %197 = sfence }
 0x173   :  { %198 = vsyncpa [#allocation5], 1 }

</bundles_post_ra>
